<compile_context>
chip_gen: v5e
topology: v5e:2x2
jax: 0.10.0
libtpu: 0.0.40
codegen_flags: <defaults>
</compile_context>

<pallas_src>
import math

import jax
import jax.numpy as jnp
from jax.experimental import pallas as pl
from jax.experimental.pallas import tpu as pltpu


def _round_up(v, m):
    return -(-v // m) * m


def _fold_upsample_into_weights(weight, dtype):
    """Fold nearest-2x upsample + 3x3 'same' conv into per-phase weights.

    weight: (C_out, C_in, 3, 3) OIHW.  Returns Wf of shape (2, 2, 3*C_in, 2*C_out)
    such that

      out[2m+py, 2n+px, co] = bias[co] +
        sum_{a in {0,1}, b in {0,1,2}, ci}
            x_pad[m + py + a, n + b, ci] * Wf[py, a, b*C_in + ci, px*C_out + co]

    where x_pad is the ORIGINAL-resolution image zero-padded by 1 pixel.
    Exact 0/1 tap selection, summed in f32 before the cast to `dtype`.
    """
    w = weight.astype(jnp.float32)
    co, ci, _, _ = w.shape

    # rowmat[ky, py, a] = 1 iff padded source row for tap ky of phase py is m+py+a
    kyv = jnp.arange(3)[:, None, None]
    pyv = jnp.arange(2)[None, :, None]
    av = jnp.arange(2)[None, None, :]
    rowmat = (((pyv + kyv + 1) // 2) == (pyv + av)).astype(jnp.float32)   # (3,2,2)

    # colmat[kx, px, b] = 1 iff padded source col for tap kx of phase px is n+b
    kxv = jnp.arange(3)[:, None, None]
    pxv = jnp.arange(2)[None, :, None]
    bv = jnp.arange(3)[None, None, :]
    colmat = (((pxv + kxv + 1) // 2) == bv).astype(jnp.float32)           # (3,2,3)

    wf = jnp.einsum("oiyx,yqa,xpb->qabipo", w, rowmat, colmat)            # (2,2,3,ci,2,co)
    return wf.reshape(2, 2, 3 * ci, 2 * co).astype(dtype)


def upsample_conv_kernel(xa_ref, xh_ref, w_ref, b_ref, o_ref):
    """Fused nearest-2x upsample + 3x3 'same' conv for one (image, row-tile).

    xa_ref : (1, TB, Wp+2, C)       body rows of the 1px zero-padded NHWC input
    xh_ref : (1, 2,  Wp+2, C)       2 halo rows (rows TB, TB+1 of this window)
    w_ref  : (2, 2, 3*C, 2*Cout)    phase-folded weights [py, a, (b,ci), (px,co)]
    b_ref  : (1, 2*Cout)            bias tiled over the px phase (f32)
    o_ref  : (1, TB, 2, Wp, 2*Cout) flat row-major layout == NHWC (2*TB, 2*Wp, Cout)
    """
    tb = xa_ref.shape[1]
    wp = o_ref.shape[3]
    cin = xa_ref.shape[3]
    cdt = w_ref.dtype                                   # MXU input dtype

    # All TB+2 padded rows this tile needs (leading-dim concat: plane copy only).
    xr = jnp.concatenate([xa_ref[0], xh_ref[0]], axis=0)          # (TB+2, Wp+2, C)

    # Shared column-tap buffer, built ONCE and reused by both row phases.
    # Lane order (b, ci) matches the folded-weight K ordering.
    taps = jnp.concatenate([xr[:, b:b + wp, :] for b in range(3)],
                           axis=-1).astype(cdt)                   # (TB+2, Wp, 3C)

    bias = b_ref[...].astype(jnp.float32)                         # (1, 2*Cout)
    for py in (0, 1):                                             # static unroll
        t0 = taps[py:py + tb].reshape(tb * wp, 3 * cin)           # a = 0 rows
        t1 = taps[py + 1:py + 1 + tb].reshape(tb * wp, 3 * cin)   # a = 1 rows
        acc = jnp.dot(t0, w_ref[py, 0], preferred_element_type=jnp.float32)
        acc = acc + jnp.dot(t1, w_ref[py, 1], preferred_element_type=jnp.float32)
        acc = acc + bias
        # Direct per-phase store (no jnp.stack of both phases); lane width 2*Cout.
        o_ref[0, :, py, :, :] = acc.reshape(tb, wp, -1).astype(o_ref.dtype)


def _vmem_budget():
    """Generation-aware (per-step VMEM budget, scoped-VMEM limit) in bytes."""
    cap = None
    try:
        cap = int(pltpu.get_tpu_info().vmem_capacity_bytes)
    except Exception:
        cap = None
    if not cap or cap <= 0:
        cap = 64 << 20                      # conservative fallback: v7x-class 64 MiB
    budget = max(4 << 20, cap // 6)         # ~21 MiB on 128 MiB chips, ~11 MiB on v7x
    limit = max(32 << 20, min((cap * 5) // 8, cap - (16 << 20)))
    return budget, limit


def _pick_tile_rows(h, w_pad, c, cout, in_isz, cmp_isz, out_isz, w_buffers,
                    budget_bytes):
    """Largest EVEN row-tile whose per-step VMEM footprint fits the budget.

    Counts double-buffered body/halo input blocks, the double-buffered output
    block (tb x 2 x w x 2*cout), the resident folded-weight block (1 or 2
    buffers), the shared (tb+2, w, 3c) column-tap buffer and one live f32
    accumulator (one row phase at a time).
    """
    cap_tb = max(2, _round_up(h, 2))

    def footprint(tb):
        body = 2 * tb * (w_pad + 2) * c * in_isz
        halo = 2 * 2 * (w_pad + 2) * c * in_isz
        outb = 2 * tb * 2 * w_pad * 2 * cout * out_isz
        wgt = w_buffers * 2 * 2 * 3 * c * 2 * cout * cmp_isz
        taps = (tb + 2) * w_pad * 3 * c * cmp_isz
        acc = tb * w_pad * 2 * cout * 4
        bias = 2 * 2 * cout * 4
        return body + halo + outb + wgt + taps + acc + bias

    best = 2
    for tb in range(2, cap_tb + 1, 2):
        if footprint(tb) <= budget_bytes:
            best = tb
        else:
            break                                   # footprint is monotone in tb
    return best


def upsample_forward(x, weight, bias, use_conv=True, tile_rows=None,
                     compute_dtype=None, out_layout="NCHW"):
    """Equivalent of Upsample.forward. x: (N,C,H,W) NCHW; weight OIHW; bias (C,)."""
    n, c, h, w = x.shape
    if not use_conv:
        # Pure index replication, no compute -> leave as XLA glue.
        x_up = jnp.repeat(jnp.repeat(x, 2, axis=2), 2, axis=3)
        return jnp.transpose(x_up, (0, 2, 3, 1)) if out_layout == "NHWC" else x_up

    cout = weight.shape[0]
    out_dtype = x.dtype
    compute_dtype = jnp.dtype(x.dtype if compute_dtype is None else compute_dtype)

    in_isz = compute_dtype.itemsize
    cmp_isz = compute_dtype.itemsize
    out_isz = jnp.dtype(out_dtype).itemsize

    # Pad W so the conv-output width is a multiple of 8 (layout-preserving
    # reshapes and dense phase stores inside the kernel).
    w_pad = _round_up(w, 8)

    budget, vmem_limit = _vmem_budget()

    # Single-buffer large resident folded-weight blocks (constant index_map ->
    # never re-fetched); frees ~weight-size of VMEM, which matters on v7x.
    weight_bytes = 2 * 2 * 3 * c * 2 * cout * cmp_isz
    weight_single_buffered = weight_bytes > (2 << 20)
    w_buffers = 1 if weight_single_buffered else 2

    if tile_rows is None:
        tb = _pick_tile_rows(h, w_pad, c, cout, in_isz, cmp_isz, out_isz,
                             w_buffers, budget)
    else:
        tb = max(2, int(tile_rows) + (int(tile_rows) & 1))     # force even
    n_tiles = -(-h // tb)                                      # cdiv: ragged H ok
    h_pad = n_tiles * tb

    # Cheap prep on the small (pre-upsample) input: NCHW -> NHWC, cast to the
    # compute dtype, then zero pad (1px conv halo + tiling/W-alignment pad).
    x_nhwc = jnp.transpose(x, (0, 2, 3, 1))
    if x_nhwc.dtype != compute_dtype:
        x_nhwc = x_nhwc.astype(compute_dtype)
    x_padded = jnp.pad(x_nhwc, ((0, 0), (1, 1 + h_pad - h),
                                (1, 1 + w_pad - w), (0, 0)))

    w_fold = _fold_upsample_into_weights(weight, compute_dtype)   # (2,2,3C,2Cout)
    bias2 = jnp.tile(bias.astype(jnp.float32), 2).reshape(1, 2 * cout)

    body_spec = pl.BlockSpec((1, tb, w_pad + 2, c), lambda i, r: (i, r, 0, 0))
    halo_spec = pl.BlockSpec((1, 2, w_pad + 2, c),
                             lambda i, r: (i, (r + 1) * (tb // 2), 0, 0))
    if weight_single_buffered:
        w_spec = pl.BlockSpec((2, 2, 3 * c, 2 * cout), lambda i, r: (0, 0, 0, 0),
                              pipeline_mode=pl.Buffered(1))
    else:
        w_spec = pl.BlockSpec((2, 2, 3 * c, 2 * cout), lambda i, r: (0, 0, 0, 0))
    b_spec = pl.BlockSpec((1, 2 * cout), lambda i, r: (0, 0))
    out_spec = pl.BlockSpec((1, tb, 2, w_pad, 2 * cout),
                            lambda i, r: (i, r, 0, 0, 0))

    flops = 2 * n * h_pad * w_pad * 2 * (6 * c) * (2 * cout)
    bytes_accessed = int(x_padded.size) * in_isz + weight_bytes + 2 * cout * 4 \
        + n * h_pad * 2 * w_pad * 2 * cout * out_isz

    out6 = pl.pallas_call(
        upsample_conv_kernel,
        out_shape=jax.ShapeDtypeStruct((n, h_pad, 2, w_pad, 2 * cout), out_dtype),
        grid_spec=pltpu.PrefetchScalarGridSpec(
            num_scalar_prefetch=0,
            grid=(n, n_tiles),
            in_specs=[body_spec, halo_spec, w_spec, b_spec],
            out_specs=out_spec,
        ),
        compiler_params=pltpu.CompilerParams(
            dimension_semantics=("parallel", "parallel"),
            vmem_limit_bytes=int(vmem_limit),
        ),
        cost_estimate=pl.CostEstimate(flops=flops, transcendentals=0,
                                      bytes_accessed=bytes_accessed),
    )(x_padded, x_padded, w_fold, bias2)

    # (N, Hp, 2, Wp, 2*Cout) row-major == NHWC (N, 2Hp, 2Wp, Cout); crop the
    # H/W alignment pads (no-op slices when H, W were already aligned).
    out_nhwc = out6[:, :h, :, :w, :].reshape(n, 2 * h, 2 * w, cout)
    if out_layout == "NHWC":
        return out_nhwc
    # TODO(synk): trailing NHWC->NCHW kept in XLA (single pass over the output);
    #             prefer out_layout="NHWC" inside a full model.
    return jnp.transpose(out_nhwc, (0, 3, 1, 2))


if __name__ == "__main__":
    key = jax.random.PRNGKey(0)

    def ref_forward(x, weight, bias, use_conv=True):
        x_up = jnp.repeat(jnp.repeat(x, 2, axis=2), 2, axis=3)
        if not use_conv:
            return x_up
        return jax.lax.conv_general_dilated(
            x_up, weight, window_strides=(1, 1), padding=((1, 1), (1, 1)),
            dimension_numbers=("NCHW", "OIHW", "NCHW"),
        ) + bias[None, :, None, None]

    # (batch, channels, H, W, tile_rows)
    configs = [
        (2, 4, 16, 16, 8),      # row tiling + cross-tile halo
        (1, 8, 12, 20, None),   # auto tile size, W padded 20 -> 24
        (1, 4, 7, 9, 4),        # ragged H (7 rows, tb=4 -> pad to 8), W 9 -> 16
    ]
    for (nb, c, h, w, tr) in configs:
        key, kx, kw, kb = jax.random.split(key, 4)
        x = jax.random.normal(kx, (nb, c, h, w), jnp.float32)

        fan_in = c * 3 * 3
        bound = 1.0 / math.sqrt(fan_in)
        weight = jax.random.uniform(kw, (c, c, 3, 3), jnp.float32, -bound, bound)
        bias = jax.random.uniform(kb, (c,), jnp.float32, -bound, bound)

        ref = ref_forward(x, weight, bias, use_conv=True)

        out = jax.block_until_ready(
            upsample_forward(x, weight, bias, use_conv=True, tile_rows=tr))
        assert out.shape == (nb, c, 2 * h, 2 * w), out.shape
        err = float(jnp.max(jnp.abs(out - ref)))
        assert jnp.allclose(out, ref, atol=2e-4, rtol=2e-4), err

        # NHWC output path (skips the trailing NCHW transpose).
        out_nhwc = jax.block_until_ready(
            upsample_forward(x, weight, bias, use_conv=True, tile_rows=tr,
                             out_layout="NHWC"))
        assert jnp.allclose(out_nhwc, jnp.transpose(ref, (0, 2, 3, 1)),
                            atol=2e-4, rtol=2e-4)

        # bf16 MXU-feed path (f32 accumulation); loose tolerance for bf16 inputs.
        out_bf = jax.block_until_ready(
            upsample_forward(x, weight, bias, use_conv=True, tile_rows=tr,
                             compute_dtype=jnp.bfloat16))
        err_bf = float(jnp.max(jnp.abs(out_bf - ref)))
        assert jnp.allclose(out_bf, ref, atol=1.5e-1, rtol=1e-1), err_bf

        # use_conv=False branch (pure nearest upsample).
        out_nc = jax.block_until_ready(
            upsample_forward(x, weight, bias, use_conv=False))
        assert jnp.array_equal(out_nc, ref_forward(x, weight, bias, use_conv=False))

    print("KERNEL_OK")
</pallas_src>

<mosaic_0001>
module attributes {stable_mosaic.version = 11 : i64} {
  func.func @upsample_conv_kernel(%arg0: i32, %arg1: i32, %arg2: memref<1x8x18x4xf32, #tpu.memory_space<vmem>>, %arg3: memref<1x2x18x4xf32, #tpu.memory_space<vmem>>, %arg4: memref<2x2x12x8xf32, #tpu.memory_space<vmem>>, %arg5: memref<1x8xf32, #tpu.memory_space<vmem>>, %arg6: memref<1x8x2x16x8xf32, #tpu.memory_space<vmem>>) attributes {dimension_semantics = [#tpu.dimension_semantics<parallel>, #tpu.dimension_semantics<parallel>], iteration_bounds = array<i64: 2, 2>, scalar_prefetch = 0 : i64, scratch_operands = 0 : i64, tpu.core_type = #tpu.core_type<tc>, window_params = [{transform_indices = @transform_0, window_bounds = array<i64: 1, 8, 18, 4>}, {transform_indices = @transform_1, window_bounds = array<i64: 1, 2, 18, 4>}, {pipeline_mode = #tpu.pipeline_mode<synchronous>, transform_indices = @transform_2, window_bounds = array<i64: 2, 2, 12, 8>}, {pipeline_mode = #tpu.pipeline_mode<synchronous>, transform_indices = @transform_3, window_bounds = array<i64: 1, 8>}, {transform_indices = @transform_4, window_bounds = array<i64: 1, 8, 2, 16, 8>}]} {
    %c0 = arith.constant 0 : index
    %c0_0 = arith.constant 0 : index
    %c0_1 = arith.constant 0 : index
    %c0_2 = arith.constant 0 : index
    %0 = vector.load %arg2[%c0, %c0_0, %c0_1, %c0_2] : memref<1x8x18x4xf32, #tpu.memory_space<vmem>>, vector<1x8x18x4xf32>
    %1 = vector.shape_cast %0 : vector<1x8x18x4xf32> to vector<8x18x4xf32>
    %c0_3 = arith.constant 0 : index
    %c0_4 = arith.constant 0 : index
    %c0_5 = arith.constant 0 : index
    %c0_6 = arith.constant 0 : index
    %2 = vector.load %arg3[%c0_3, %c0_4, %c0_5, %c0_6] : memref<1x2x18x4xf32, #tpu.memory_space<vmem>>, vector<1x2x18x4xf32>
    %3 = vector.shape_cast %2 : vector<1x2x18x4xf32> to vector<2x18x4xf32>
    %4 = tpu.concatenate %1, %3 in 0 : vector<8x18x4xf32>, vector<2x18x4xf32> -> vector<10x18x4xf32>
    %5 = vector.extract_strided_slice %4 {offsets = [0, 0, 0], sizes = [10, 16, 4], strides = [1, 1, 1]} : vector<10x18x4xf32> to vector<10x16x4xf32>
    %6 = vector.extract_strided_slice %4 {offsets = [0, 1, 0], sizes = [10, 16, 4], strides = [1, 1, 1]} : vector<10x18x4xf32> to vector<10x16x4xf32>
    %7 = vector.extract_strided_slice %4 {offsets = [0, 2, 0], sizes = [10, 16, 4], strides = [1, 1, 1]} : vector<10x18x4xf32> to vector<10x16x4xf32>
    %8 = tpu.concatenate %5, %6, %7 in 2 : vector<10x16x4xf32>, vector<10x16x4xf32>, vector<10x16x4xf32> -> vector<10x16x12xf32>
    %c0_7 = arith.constant 0 : index
    %c0_8 = arith.constant 0 : index
    %9 = vector.load %arg5[%c0_7, %c0_8] : memref<1x8xf32, #tpu.memory_space<vmem>>, vector<1x8xf32>
    %10 = vector.extract_strided_slice %8 {offsets = [0, 0, 0], sizes = [8, 16, 12], strides = [1, 1, 1]} : vector<10x16x12xf32> to vector<8x16x12xf32>
    %11 = vector.shape_cast %10 : vector<8x16x12xf32> to vector<128x12xf32>
    %12 = vector.extract_strided_slice %8 {offsets = [1, 0, 0], sizes = [8, 16, 12], strides = [1, 1, 1]} : vector<10x16x12xf32> to vector<8x16x12xf32>
    %13 = vector.shape_cast %12 : vector<8x16x12xf32> to vector<128x12xf32>
    %c0_9 = arith.constant 0 : index
    %c0_10 = arith.constant 0 : index
    %c0_11 = arith.constant 0 : index
    %c0_12 = arith.constant 0 : index
    %14 = vector.load %arg4[%c0_9, %c0_10, %c0_11, %c0_12] : memref<2x2x12x8xf32, #tpu.memory_space<vmem>>, vector<1x1x12x8xf32>
    %15 = vector.shape_cast %14 : vector<1x1x12x8xf32> to vector<12x8xf32>
    %cst = arith.constant dense<0.000000e+00> : vector<128x8xf32>
    %16 = tpu.matmul %11, %15, %cst {dimension_numbers = #tpu.dot_dimension_numbers<[1], [0], [0], [1], [0, 0, 1, 1], [], []>} : vector<128x12xf32>, vector<12x8xf32>, vector<128x8xf32> -> vector<128x8xf32>
    %c0_13 = arith.constant 0 : index
    %c1 = arith.constant 1 : index
    %c0_14 = arith.constant 0 : index
    %c0_15 = arith.constant 0 : index
    %17 = vector.load %arg4[%c0_13, %c1, %c0_14, %c0_15] : memref<2x2x12x8xf32, #tpu.memory_space<vmem>>, vector<1x1x12x8xf32>
    %18 = vector.shape_cast %17 : vector<1x1x12x8xf32> to vector<12x8xf32>
    %cst_16 = arith.constant dense<0.000000e+00> : vector<128x8xf32>
    %19 = tpu.matmul %13, %18, %cst_16 {dimension_numbers = #tpu.dot_dimension_numbers<[1], [0], [0], [1], [0, 0, 1, 1], [], []>} : vector<128x12xf32>, vector<12x8xf32>, vector<128x8xf32> -> vector<128x8xf32>
    %20 = arith.addf %16, %19 : vector<128x8xf32>
    %21 = vector.broadcast %9 : vector<1x8xf32> to vector<128x8xf32>
    %22 = arith.addf %20, %21 : vector<128x8xf32>
    %23 = vector.shape_cast %22 : vector<128x8xf32> to vector<8x16x8xf32>
    %c0_17 = arith.constant 0 : index
    %c0_18 = arith.constant 0 : index
    %c0_19 = arith.constant 0 : index
    %c0_20 = arith.constant 0 : index
    %c0_21 = arith.constant 0 : index
    %24 = vector.load %arg6[%c0_17, %c0_18, %c0_19, %c0_20, %c0_21] : memref<1x8x2x16x8xf32, #tpu.memory_space<vmem>>, vector<1x8x1x16x8xf32>
    %25 = vector.shape_cast %24 : vector<1x8x1x16x8xf32> to vector<8x16x8xf32>
    %26 = vector.shape_cast %23 : vector<8x16x8xf32> to vector<1x8x1x16x8xf32>
    tpu.vector_store %arg6[%c0_17, %c0_18, %c0_19, %c0_20, %c0_21], %26 {strides = array<i32>} : memref<1x8x2x16x8xf32, #tpu.memory_space<vmem>>, vector<1x8x1x16x8xf32>,
    %27 = vector.extract_strided_slice %8 {offsets = [1, 0, 0], sizes = [8, 16, 12], strides = [1, 1, 1]} : vector<10x16x12xf32> to vector<8x16x12xf32>
    %28 = vector.shape_cast %27 : vector<8x16x12xf32> to vector<128x12xf32>
    %29 = vector.extract_strided_slice %8 {offsets = [2, 0, 0], sizes = [8, 16, 12], strides = [1, 1, 1]} : vector<10x16x12xf32> to vector<8x16x12xf32>
    %30 = vector.shape_cast %29 : vector<8x16x12xf32> to vector<128x12xf32>
    %c1_22 = arith.constant 1 : index
    %c0_23 = arith.constant 0 : index
    %c0_24 = arith.constant 0 : index
    %c0_25 = arith.constant 0 : index
    %31 = vector.load %arg4[%c1_22, %c0_23, %c0_24, %c0_25] : memref<2x2x12x8xf32, #tpu.memory_space<vmem>>, vector<1x1x12x8xf32>
    %32 = vector.shape_cast %31 : vector<1x1x12x8xf32> to vector<12x8xf32>
    %cst_26 = arith.constant dense<0.000000e+00> : vector<128x8xf32>
    %33 = tpu.matmul %28, %32, %cst_26 {dimension_numbers = #tpu.dot_dimension_numbers<[1], [0], [0], [1], [0, 0, 1, 1], [], []>} : vector<128x12xf32>, vector<12x8xf32>, vector<128x8xf32> -> vector<128x8xf32>
    %c1_27 = arith.constant 1 : index
    %c1_28 = arith.constant 1 : index
    %c0_29 = arith.constant 0 : index
    %c0_30 = arith.constant 0 : index
    %34 = vector.load %arg4[%c1_27, %c1_28, %c0_29, %c0_30] : memref<2x2x12x8xf32, #tpu.memory_space<vmem>>, vector<1x1x12x8xf32>
    %35 = vector.shape_cast %34 : vector<1x1x12x8xf32> to vector<12x8xf32>
    %cst_31 = arith.constant dense<0.000000e+00> : vector<128x8xf32>
    %36 = tpu.matmul %30, %35, %cst_31 {dimension_numbers = #tpu.dot_dimension_numbers<[1], [0], [0], [1], [0, 0, 1, 1], [], []>} : vector<128x12xf32>, vector<12x8xf32>, vector<128x8xf32> -> vector<128x8xf32>
    %37 = arith.addf %33, %36 : vector<128x8xf32>
    %38 = vector.broadcast %9 : vector<1x8xf32> to vector<128x8xf32>
    %39 = arith.addf %37, %38 : vector<128x8xf32>
    %40 = vector.shape_cast %39 : vector<128x8xf32> to vector<8x16x8xf32>
    %c0_32 = arith.constant 0 : index
    %c0_33 = arith.constant 0 : index
    %c1_34 = arith.constant 1 : index
    %c0_35 = arith.constant 0 : index
    %c0_36 = arith.constant 0 : index
    %41 = vector.load %arg6[%c0_32, %c0_33, %c1_34, %c0_35, %c0_36] : memref<1x8x2x16x8xf32, #tpu.memory_space<vmem>>, vector<1x8x1x16x8xf32>
    %42 = vector.shape_cast %41 : vector<1x8x1x16x8xf32> to vector<8x16x8xf32>
    %43 = vector.shape_cast %40 : vector<8x16x8xf32> to vector<1x8x1x16x8xf32>
    tpu.vector_store %arg6[%c0_32, %c0_33, %c1_34, %c0_35, %c0_36], %43 {strides = array<i32>} : memref<1x8x2x16x8xf32, #tpu.memory_space<vmem>>, vector<1x8x1x16x8xf32>,
    return
  }
  func.func @transform_0(%arg0: i32, %arg1: i32) -> (i32, i32, i32, i32) {
    %c0_i32 = arith.constant 0 : i32
    %c0_i32_0 = arith.constant 0 : i32
    %c0_i32_1 = arith.constant 0 : i32
    return %arg0, %arg1, %c0_i32, %c0_i32_0 : i32, i32, i32, i32
  }
  func.func @transform_1(%arg0: i32, %arg1: i32) -> (i32, i32, i32, i32) {
    %c1_i32 = arith.constant 1 : i32
    %0 = arith.addi %arg1, %c1_i32 : i32
    %c4_i32 = arith.constant 4 : i32
    %1 = arith.muli %0, %c4_i32 : i32
    %c0_i32 = arith.constant 0 : i32
    %c0_i32_0 = arith.constant 0 : i32
    %c0_i32_1 = arith.constant 0 : i32
    return %arg0, %1, %c0_i32, %c0_i32_0 : i32, i32, i32, i32
  }
  func.func @transform_2(%arg0: i32, %arg1: i32) -> (i32, i32, i32, i32) {
    %c0_i32 = arith.constant 0 : i32
    %c0_i32_0 = arith.constant 0 : i32
    %c0_i32_1 = arith.constant 0 : i32
    %c0_i32_2 = arith.constant 0 : i32
    %c0_i32_3 = arith.constant 0 : i32
    return %c0_i32, %c0_i32_0, %c0_i32_1, %c0_i32_2 : i32, i32, i32, i32
  }
  func.func @transform_3(%arg0: i32, %arg1: i32) -> (i32, i32) {
    %c0_i32 = arith.constant 0 : i32
    %c0_i32_0 = arith.constant 0 : i32
    %c0_i32_1 = arith.constant 0 : i32
    return %c0_i32, %c0_i32_0 : i32, i32
  }
  func.func @transform_4(%arg0: i32, %arg1: i32) -> (i32, i32, i32, i32, i32) {
    %c0_i32 = arith.constant 0 : i32
    %c0_i32_0 = arith.constant 0 : i32
    %c0_i32_1 = arith.constant 0 : i32
    %c0_i32_2 = arith.constant 0 : i32
    return %arg0, %arg1, %c0_i32, %c0_i32_0, %c0_i32_1 : i32, i32, i32, i32, i32
  }
}

</mosaic_0001>

<bundles_post_ra>
// kernel: tpu_custom_call.1
= control target key start
LH: loop header
LB: loop body
LE: loop exit
PB: predicated region body
PF: predicated region fallthrough
CT: control target
= control target key end

     0   :  { %s1408_s15 = smov 0   ;;  %s1410_s16 = smov 0   ;;  %s1932_s0 = inlined_call_operand.vmem [shape: f32[2,18,18,4], index: 0, kind: input, shape index: {}]   ;;  %s1933_s1 = inlined_call_operand.vmem [shape: f32[2,18,18,4], index: 1, kind: input, shape index: {}]   ;;  %s1934_s2 = inlined_call_operand.vmem [shape: f32[2,2,12,8], index: 2, kind: input, shape index: {}]   ;;  %s1935_s3 = inlined_call_operand.vmem [shape: f32[1,8], index: 3, kind: input, shape index: {}]   ;;  %s1936_s4 = inlined_call_operand.vmem [shape: f32[2,16,2,16,8], index: 4, kind: output, shape index: {}]  }
   0x1   :  { %s1412_s17 = smov 0   ;;  %s1414_s18 = smov 0  }
   0x2   :  { %s1416_s19 = smov 0  }
   0x3 LB: > { %s23_s20 = sadd.s32 1, %s1371_s17  ;;  %s26_s21 = sadd.s32 1, %s1375_s18  ;;  %s1379_s19 = sphi %s1416_s19, %s14_s19   ;;  %s1375_s18 = sphi %s1414_s18, %s1940_s18   ;;  %s1371_s17 = sphi %s1412_s17, %s1939_s17   ;;  %s1367_s16 = sphi %s1410_s16, %s1938_s16   ;;  %s1363_s15 = sphi %s1408_s15, %s1937_s15  }
   0x4   : > { %p24_p0 = scmp.ge.s32.totalorder %s23_s20, 2  ;;  %p1184_p1 = scmp.ge.s32.totalorder %s1379_s19, 1 }
   0x5   : > { %p220_p2 = scmp.lt.s32.totalorder %s1379_s19, 5 }
   0x6   : > { %s1942_s20 = smov (%p24_p0, %s23_s20), 0  ;;  %s1944_s21 = smov (!%p24_p0, %s26_s21), %s1375_s18 }
   0x7   : > { %p221_p3 = pnand %p1184_p1, %p220_p2  ;;  %p28_p4 = scmp.ge.s32.totalorder %s1944_s21, 2 }
   0x8   : > { %s1438_s22 = sshll.u32 (!%p221_p3), %s1363_s15, 3  ;;  %p279_p5 = scmp.lt.s32.totalorder (!%p221_p3), %s1367_s16, 1 }
   0x9   : > { %s1946_s21 = smov (%p28_p4, %s1944_s21), 0  ;;  %224 = sbr.rel (%p221_p3) target bundleno = 417 (0x1a1), region = 36 }
   0xa   : > { %p281_p6 = scmp.lt.s32.totalorder (!%p221_p3), %s1438_s22, 17  ;;  %p312_p7 = scmp.lt.s32.totalorder (!%p221_p3), %s1438_s22, 15 }
   0xb   : > { %s1294_s9 = sadd.s32 (!%p221_p3), 8, %s1438_s22  ;;  %s1381_s10 = smov (!%p221_p3), 8  }
   0xc   : > { %s1382_s11 = smov (!%p221_p3), 4   ;;  %p299_p8 = scmp.lt.s32.totalorder (!%p221_p3), %s1294_s9, 17 }
   0xe   : > { %s1948_s16 = smov (!%p279_p5, %s1367_s16), 1  ;;  %vm491_vm0 = vcmask 1045504   ;;  %vm380_vm1 = vcmask 1046528   ;;  %s1950_s9 = smov (!%p299_p8, %s1294_s9), 17  ;;  %vm699_vm2 = vcmask 1043456   ;;  %vm602_vm3 = vcmask 31744  }
   0xf   : > { %s282_s23 = scalar_select %p281_p6, %s1438_s22, 17  ;;  %vm623_vm4 = vcmask 64512   ;;  %vm650_vm5 = vcmask 97280  }
  0x10   : > { %s1296_s24 = smul.u32 54, %s1948_s16  ;;  %s1192_s26 = sshll.u32 %s1948_s16, 6 }
  0x11   : > { %s1295_s25 = smul.u32 3, %s282_s23 }
  0x12   : > { %s313_s27 = scalar_select %p312_p7, %s1438_s22, 15 }
  0x13   : > { %s285_s28 = sadd.s32 %s1296_s24, %s1295_s25  ;;  %s1297_s12 = smul.u32 3, %s1950_s9 }
  0x14   : > { %s1186_s29 = sshll.u32 %s285_s28, 3  ;;  %s1191_s30 = sshll.u32 %s313_s27, 2 }
  0x15   : > { %s1453_s7 = scalar_lea.vmem %s1932_s0, %s1186_s29  ;;  %s1455_s8 = sadd.s32 %s1192_s26, %s1191_s30 }
  0x16   : > { %v1458_v0 = vld [vmem:[%s1453_s7 + $0x18] sm:$0xff]  ;;  %v1461_v1 = vld [vmem:[%s1453_s7 + $0x20] sm:$0xff]  ;;  %v1472_v7 = vld [vmem:[%s1453_s7 + $0x30] sm:$0xff]  ;;  %s1500_s13 = sadd.s32 %s1297_s12, %s1296_s24 }
  0x17   : > { %v497_v2 = vrot.slane %v1458_v0, 2  ;;  %v498_v3 = vrot.slane %v1461_v1, 2  ;;  %v386_v4 = vrot.slane %v1458_v0, 1  ;;  %v387_v5 = vrot.slane %v1461_v1, 1  ;;  %v1468_v6 = vld [vmem:[%s1453_s7] sm:$0xff]  ;;  %v1475_v8 = vld [vmem:[%s1453_s7 + $0x38] sm:$0xff] }
  0x18   : > { %v1480_v11 = vld [vmem:[%s1453_s7 + $0x8] sm:$0xff]  ;;  %v381_v12 = vrot.slane %v1468_v6, 1  ;;  %v502_v14 = vrot.slane %v1472_v7, 2  ;;  %v503_v15 = vrot.slane %v1475_v8, 2  ;;  %v391_v16 = vrot.slane %v1472_v7, 1  ;;  %v1519_v39 = vld [vmem:[%s1453_s7 + $0x50] sm:$0xff] }
  0x19   : > { %v499_v9 = vsel %vm491_vm0, %v497_v2, %v498_v3  ;;  %v388_v10 = vsel %vm380_vm1, %v386_v4, %v387_v5  ;;  %v382_v13 = vrot.slane %v1480_v11, 1  ;;  %v392_v17 = vrot.slane %v1475_v8, 1  ;;  %v328_v23 = vld [vmem:[%s1453_s7 + $0x40] sm:$0x3]  ;;  %v325_v24 = vld [vmem:[%s1453_s7 + $0x28] sm:$0x3] }
  0x1a   : > { %546 = vrot.lane.b32.xlu1 %v499_v9, %s1381_s10  ;;  %435 = vrot.lane.b32.xlu0 %v388_v10, %s1382_s11  ;;  %v492_v19 = vrot.slane %v1468_v6, 2  ;;  %v493_v20 = vrot.slane %v1480_v11, 2  ;;  %v504_v21 = vsel %vm491_vm0, %v502_v14, %v503_v15  ;;  %v394_v26 = vrot.slane %v328_v23, 1  ;;  %v322_v31 = vld [vmem:[%s1453_s7 + $0x10] sm:$0x3]  ;;  %v1516_v38 = vld [vmem:[%s1453_s7 + $0x48] sm:$0xff] }
  0x1b   : > { %v383_v18 = vsel %vm380_vm1, %v381_v12, %v382_v13  ;;  %v393_v22 = vsel %vm380_vm1, %v391_v16, %v392_v17  ;;  %v389_v27 = vrot.slane %v325_v24, 1  ;;  %v500_v28 = vrot.slane %v325_v24, 2  ;;  %v331_v45 = vld [vmem:[%s1453_s7 + $0x58] sm:$0x3]  ;;  %v1533_v49 = vld [vmem:[%s1453_s7 + $0x60] sm:$0xff]  ;;  %v1536_v50 = vld [vmem:[%s1453_s7 + $0x68] sm:$0xff] }
  0x1c   : > { %431 = vrot.lane.b32.xlu2 %v383_v18, %s1382_s11  ;;  %v494_v25 = vsel %vm491_vm0, %v492_v19, %v493_v20  ;;  %v395_v29 = vsel %vm380_vm1, %v392_v17, %v394_v26  ;;  %v505_v33 = vrot.slane %v328_v23, 2  ;;  %v384_v34 = vrot.slane %v322_v31, 1  ;;  %v334_v58 = vld [vmem:[%s1453_s7 + $0x70] sm:$0x3]  ;;  %v1553_v63 = vld [vmem:[%s1453_s7 + $0x78] sm:$0xff]  ;;  %s1189_s25 = sshll.u32 %s1500_s13, 3 }
  0x1d   : > { %v390_v30 = vsel %vm380_vm1, %v387_v5, %v389_v27  ;;  %v501_v32 = vsel %vm491_vm0, %v498_v3, %v500_v28  ;;  %v495_v35 = vrot.slane %v322_v31, 2  ;;  %v396_v41 = vrot.slane %v1516_v38, 1  ;;  %v1560_v5 = vld [vmem:[%s1453_s7 + $0x80] sm:$0xff]  ;;  %v337_v9 = vld [vmem:[%s1453_s7 + $0x88] sm:$0x3]  ;;  %v1573_v19 = vld [vmem:[%s1453_s7 + $0x90] sm:$0xff]  ;;  %s1623_s28 = scalar_lea.vmem %s1933_s1, %s1189_s25 }
  0x1e   : > { %v506_v36 = vsel %vm491_vm0, %v503_v15, %v505_v33  ;;  %v385_v37 = vsel %vm380_vm1, %v382_v13, %v384_v34  ;;  %v397_v42 = vrot.slane %v1519_v39, 1  ;;  %v507_v43 = vrot.slane %v1516_v38, 2  ;;  %v340_v28 = vld [vmem:[%s1453_s7 + $0xa0] sm:$0x3]  ;;  %v646_v33 = vld [vmem:[%s1934_s2 + $0x8] sm:$0xf] }
  0x1f   : > { %v496_v40 = vsel %vm491_vm0, %v493_v20, %v495_v35  ;;  %v508_v44 = vrot.slane %v1519_v39, 2  ;;  %v399_v46 = vrot.slane %v331_v45, 1  ;;  %v510_v52 = vrot.slane %v331_v45, 2  ;;  %v1576_v20 = vld [vmem:[%s1453_s7 + $0x98] sm:$0xff]  ;;  %v1231_v34 = vld [vmem:[%s1934_s2 + $0x28] sm:$0xf]  ;;  %1213 = vmatpush.msk.msra.mxu1 %vm699_vm2, %v646_v33 }
  0x20   : > { %v398_v47 = vsel %vm380_vm1, %v396_v41, %v397_v42  ;;  %v401_v53 = vrot.slane %v1533_v49, 1  ;;  %v402_v54 = vrot.slane %v1536_v50, 1  ;;  %v512_v55 = vrot.slane %v1533_v49, 2  ;;  %1251 = vmatpush.msk.msra.mxu3 %vm699_vm2, %v1231_v34 }
  0x21   : > { %v509_v48 = vsel %vm491_vm0, %v507_v43, %v508_v44  ;;  %v400_v51 = vsel %vm380_vm1, %v397_v42, %v399_v46  ;;  %v511_v56 = vsel %vm491_vm0, %v508_v44, %v510_v52  ;;  %v513_v59 = vrot.slane %v1536_v50, 2  ;;  %v343_v43 = vld [vmem:[%s1453_s7 + $0xb8] sm:$0x3]  ;;  %v1631_v52 = vld [vmem:[%s1623_s28 + $0x8] sm:$0xff] }
  0x22   : > { %550 = vrot.lane.b32.xlu1 %v504_v21, %s1381_s10  ;;  %439 = vrot.lane.b32.xlu0 %v393_v22, %s1382_s11  ;;  %v403_v57 = vsel %vm380_vm1, %v401_v53, %v402_v54  ;;  %v404_v61 = vrot.slane %v334_v58, 1  ;;  %v515_v62 = vrot.slane %v334_v58, 2  ;;  %v406_v2 = vrot.slane %v1553_v63, 1  ;;  %v346_v58 = vld [vmem:[%s1623_s28 + $0x10] sm:$0x3] }
  0x23   : > { %v514_v60 = vsel %vm491_vm0, %v512_v55, %v513_v59  ;;  %v407_v10 = vrot.slane %v1560_v5, 1  ;;  %v517_v13 = vrot.slane %v1553_v63, 2  ;;  %v518_v14 = vrot.slane %v1560_v5, 2  ;;  %v1194_v55 = vld [vmem:[%s1934_s2 + $0x10] sm:$0xff] }
  0x24   : > { %542 = vrot.lane.b32.xlu2 %v494_v25, %s1381_s10  ;;  %v405_v3 = vsel %vm380_vm1, %v402_v54, %v404_v61  ;;  %v516_v4 = vsel %vm491_vm0, %v513_v59, %v515_v62  ;;  %v409_v15 = vrot.slane %v337_v9, 1  ;;  %v520_v16 = vrot.slane %v337_v9, 2  ;;  %v1232_v9 = vld [vmem:[%s1934_s2 + $0x30] sm:$0xff] }
  0x25   : > { %v408_v12 = vsel %vm380_vm1, %v406_v2, %v407_v10  ;;  %v519_v17 = vsel %vm491_vm0, %v517_v13, %v518_v14  ;;  %v411_v22 = vrot.slane %v1573_v19, 1  ;;  %v412_v23 = vrot.slane %v1576_v20, 1  ;;  %v1233_v2 = vld [vmem:[%s1934_s2 + $0x38] sm:$0xf] }
  0x26   : > { %v410_v18 = vsel %vm380_vm1, %v407_v10, %v409_v15  ;;  %v521_v21 = vsel %vm491_vm0, %v518_v14, %v520_v16  ;;  %v522_v24 = vrot.slane %v1573_v19, 2  ;;  %v523_v25 = vrot.slane %v1576_v20, 2  ;;  %1234 = vmatpush.msk.msra.mxu2 %vm699_vm2, %v1233_v2  ;;  %v1663_v10 = vld [vmem:[%s1623_s28 + $0x18] sm:$0xff] }
  0x27   : > { %v413_v26 = vsel %vm380_vm1, %v411_v22, %v412_v23  ;;  %v414_v31 = vrot.slane %v340_v28, 1  ;;  %v419_v44 = vrot.slane %v343_v43, 1  ;;  %v530_v46 = vrot.slane %v343_v43, 2 }
  0x28   : > { %v524_v27 = vsel %vm491_vm0, %v522_v24, %v523_v25  ;;  %v533_v54 = vrot.slane %v1631_v52, 2  ;;  %v424_v61 = vrot.slane %v346_v58, 1  ;;  %907 = vmatpush.msra.mxu2 %v1232_v9  ;;  %v426_v14 = vrot.slane %v1663_v10, 1 }
  0x29   : > { %v415_v35 = vsel %vm380_vm1, %v412_v23, %v414_v31  ;;  %v537_v16 = vrot.slane %v1663_v10, 2 }
  0x2a   : > { %441 = vrot.lane.b32.xlu1 %v395_v29, %s1382_s11  ;;  %437 = vrot.lane.b32.xlu0 %v390_v30, %s1382_s11  ;;  %v1590_v29 = vld [vmem:[%s1453_s7 + $0xa8] sm:$0xff]  ;;  %v1593_v30 = vld [vmem:[%s1453_s7 + $0xb0] sm:$0xff] }
  0x2b   : > { %v528_v45 = vrot.slane %v1593_v30, 2  ;;  %v527_v62 = vrot.slane %v1590_v29, 2 }
  0x2c   : > { %548 = vrot.lane.b32.xlu2 %v501_v32, %s1381_s10  ;;  %v1195_v32 = vld [vmem:[%s1934_s2 + $0x18] sm:$0xf] }
  0x2d   : > { %1196 = vmatpush.msk.msra.mxu0 %vm699_vm2, %v1195_v32 }
  0x2f   : > { %718 = vmatpush.msra.mxu0 %v1194_v55 }
  0x32   : > { %552 = vrot.lane.b32.xlu0 %v506_v36, %s1381_s10  ;;  %433 = vrot.lane.b32.xlu1 %v385_v37, %s1382_s11  ;;  %v525_v36 = vrot.slane %v340_v28, 2  ;;  %v416_v37 = vrot.slane %v1590_v29, 1 }
  0x34   : > { %544 = vrot.lane.b32.xlu2 %v496_v40, %s1381_s10  ;;  %v417_v40 = vrot.slane %v1593_v30, 1  ;;  %v526_v41 = vsel %vm491_vm0, %v523_v25, %v525_v36  ;;  %v349_v25 = vld [vmem:[%s1623_s28 + $0x28] sm:$0x3] }
  0x35   : > { %v429_v43 = vrot.slane %v349_v25, 1 }
  0x36   : > { %v418_v42 = vsel %vm380_vm1, %v416_v37, %v417_v40 }
  0x3a   : > { %443 = vrot.lane.b32.xlu0 %v398_v47, %s1382_s11  ;;  %554 = vrot.lane.b32.xlu1 %v509_v48, %s1381_s10  ;;  %v420_v47 = vsel %vm380_vm1, %v417_v40, %v419_v44  ;;  %v531_v48 = vsel %vm491_vm0, %v528_v45, %v530_v46 }
  0x3c   : > { %445 = vrot.lane.b32.xlu2 %v400_v51, %s1382_s11  ;;  %v1628_v51 = vld [vmem:[%s1623_s28] sm:$0xff] }
  0x3d   : > { %v532_v53 = vrot.slane %v1628_v51, 2  ;;  %v421_v24 = vrot.slane %v1628_v51, 1 }
  0x3f   : > { %v534_v59 = vsel %vm491_vm0, %v532_v53, %v533_v54 }
  0x42   : > { %556 = vrot.lane.b32.xlu0 %v511_v56, %s1381_s10  ;;  %447 = vrot.lane.b32.xlu1 %v403_v57, %s1382_s11  ;;  %v645_v56 = vld [vmem:[%s1934_s2] sm:$0xff] }
  0x43   : > { %v1230_v57 = vld [vmem:[%s1934_s2 + $0x20] sm:$0xff]  ;;  %792 = vmatpush.msra.mxu1 %v645_v56 }
  0x44   : > { %558 = vrot.lane.b32.xlu2 %v514_v60, %s1381_s10  ;;  %975 = vmatpush.msra.mxu3 %v1230_v57  ;;  %v422_v60 = vrot.slane %v1631_v52, 1 }
  0x46   : > { %v423_v28 = vsel %vm380_vm1, %v421_v24, %v422_v60 }
  0x4a   : > { %449 = vrot.lane.b32.xlu0 %v405_v3, %s1382_s11  ;;  %560 = vrot.lane.b32.xlu1 %v516_v4, %s1381_s10  ;;  %v425_v3 = vsel %vm380_vm1, %v422_v60, %v424_v61  ;;  %v529_v4 = vsel %vm491_vm0, %v527_v62, %v528_v45 }
  0x4c   : > { %451 = vrot.lane.b32.xlu2 %v408_v12, %s1382_s11  ;;  %v1666_v12 = vld [vmem:[%s1623_s28 + $0x20] sm:$0xff] }
  0x4d   : > { %v427_v15 = vrot.slane %v1666_v12, 1 }
  0x4f   : > { %v430_v45 = vsel %vm380_vm1, %v427_v15, %v429_v43 }
  0x52   : > { %562 = vrot.lane.b32.xlu0 %v519_v17, %s1381_s10  ;;  %453 = vrot.lane.b32.xlu1 %v410_v18, %s1382_s11  ;;  %v538_v17 = vrot.slane %v1666_v12, 2  ;;  %v428_v18 = vsel %vm380_vm1, %v426_v14, %v427_v15 }
  0x54   : > { %564 = vrot.lane.b32.xlu2 %v521_v21, %s1381_s10  ;;  %v539_v21 = vsel %vm491_vm0, %v537_v16, %v538_v17 }
  0x5a   : > { %455 = vrot.lane.b32.xlu0 %v413_v26, %s1382_s11  ;;  %566 = vrot.lane.b32.xlu1 %v524_v27, %s1381_s10  ;;  %v540_v27 = vrot.slane %v349_v25, 2 }
  0x5c   : > { %457 = vrot.lane.b32.xlu2 %v415_v35, %s1382_s11  ;;  %v541_v31 = vsel %vm491_vm0, %v538_v17, %v540_v27 }
  0x62   : > { %568 = vrot.lane.b32.xlu0 %v526_v41, %s1381_s10  ;;  %459 = vrot.lane.b32.xlu1 %v418_v42, %s1382_s11 }
  0x64   : > { %570 = vrot.lane.b32.xlu2 %v529_v4, %s1381_s10 }
  0x6a   : > { %461 = vrot.lane.b32.xlu0 %v420_v47, %s1382_s11  ;;  %572 = vrot.lane.b32.xlu1 %v531_v48, %s1381_s10 }
  0x6c   : > { %463 = vrot.lane.b32.xlu2 %v423_v28, %s1382_s11 }
  0x72   : > { %574 = vrot.lane.b32.xlu0 %v534_v59, %s1381_s10  ;;  %465 = vrot.lane.b32.xlu1 %v425_v3, %s1382_s11 }
  0x76   : > { %v432_v13 = vpop.permute.xlu2 %431 }
  0x77   : > { %v603_v22 = vsel %vm602_vm3, %v1468_v6, %v432_v13  ;;  %v535_v6 = vrot.slane %v346_v58, 2 }
  0x79   : > { %v536_v32 = vsel %vm491_vm0, %v533_v54, %v535_v6 }
  0x7a   : > { %467 = vrot.lane.b32.xlu0 %v428_v18, %s1382_s11  ;;  %578 = vrot.lane.b32.xlu1 %v539_v21, %s1381_s10 }
  0x7b   : > { %576 = vrot.lane.b32.xlu2 %v536_v32, %s1381_s10 }
  0x7e   : > { %v543_v23 = vpop.permute.xlu2 %542 }
  0x7f   : > { %v624_v26 = vsel %vm623_vm4, %v603_v22, %v543_v23 }
  0x80   : > { %1214 = vmatmul.msk.f32.vlgmr.msra.gmra.mxu1 %vm650_vm5, %v624_v26 }
  0x82   : > { %580 = vrot.lane.b32.xlu0 %v541_v31, %s1381_s10  ;;  %s1193_s10 = sshll.u32 %s1455_s8, 3 }
  0x83   : > { %469 = vrot.lane.b32.xlu2 %v430_v45, %s1382_s11  ;;  %s1810_s24 = scalar_lea.vmem %s1936_s4, %s1193_s10 }
  0x86   : > { %v549_v44 = vpop.permute.xlu2 %548 }
  0x8c   : > { %v547_v33 = vpop.permute.xlu1 %546  ;;  %v436_v34 = vpop.permute.xlu0 %435 }
  0x8d   : > { %v605_v35 = vsel %vm602_vm3, %v1458_v0, %v436_v34 }
  0x8e   : > { %v626_v36 = vsel %vm623_vm4, %v605_v35, %v547_v33 }
  0x8f   : > { %1197 = vmatmul.msk.f32.vlgmr.msra.gmra.mxu0 %vm650_vm5, %v626_v36  ;;  %1252 = vmatmul.msk.f32.vlgmr.msra.gmra.mxu3 %vm650_vm5, %v626_v36 }
  0x94   : > { %v551_v37 = vpop.permute.xlu1 %550  ;;  %v440_v40 = vpop.permute.xlu0 %439 }
  0x95   : > { %v607_v41 = vsel %vm602_vm3, %v1472_v7, %v440_v40  ;;  %v545_v7 = vpop.permute.xlu2 %544 }
  0x96   : > { %v628_v42 = vsel %vm623_vm4, %v607_v41, %v551_v37 }
  0x97   : > { %1235 = vmatmul.msk.f32.vlgmr.msra.gmra.mxu2 %vm650_vm5, %v628_v42 }
  0x9c   : > { %v442_v0 = vpop.permute.xlu1 %441  ;;  %v438_v46 = vpop.permute.xlu0 %437 }
  0x9d   : > { %v606_v47 = vsel %vm602_vm3, %v1461_v1, %v438_v46  ;;  %v608_v53 = vsel %vm602_vm3, %v1475_v8, %v442_v0 }
  0x9e   : > { %v627_v48 = vsel %vm623_vm4, %v606_v47, %v549_v44 }
  0x9f   : > { %1198 = vmatmul.msk.f32.gmra.mxu0 %vm650_vm5, %v627_v48  ;;  %1253 = vmatmul.msk.f32.gmra.mxu3 %vm650_vm5, %v627_v48 }
  0xa4   : > { %v553_v54 = vpop.permute.xlu0 %552  ;;  %v434_v55 = vpop.permute.xlu1 %433 }
  0xa5   : > { %v629_v56 = vsel %vm623_vm4, %v608_v53, %v553_v54  ;;  %v604_v57 = vsel %vm602_vm3, %v1480_v11, %v434_v55  ;;  %v446_v11 = vpop.permute.xlu2 %445 }
  0xa6   : > { %1236 = vmatmul.msk.f32.gmra.mxu2 %vm650_vm5, %v629_v56  ;;  %v625_v1 = vsel %vm623_vm4, %v604_v57, %v545_v7  ;;  %v610_v61 = vsel %vm602_vm3, %v1519_v39, %v446_v11 }
  0xa7   : > { %1199 = vmatmul.msk.f32.gmra.mxu0 %vm650_vm5, %v628_v42  ;;  %1215 = vmatmul.msk.f32.gmra.mxu1 %vm650_vm5, %v625_v1 }
  0xa8   : > { %1254 = vmatmul.msk.f32.gmra.mxu3 %vm650_vm5, %v628_v42 }
  0xac   : > { %v444_v58 = vpop.permute.xlu0 %443  ;;  %v555_v59 = vpop.permute.xlu1 %554 }
  0xad   : > { %v609_v8 = vsel %vm602_vm3, %v1516_v38, %v444_v58  ;;  %v559_v4 = vpop.permute.xlu2 %558 }
  0xae   : > { %v630_v60 = vsel %vm623_vm4, %v609_v8, %v555_v59 }
  0xaf   : > { %1200 = vmatmul.msk.f32.gmra.mxu0 %vm650_vm5, %v629_v56  ;;  %1216 = vmatmul.msk.f32.gmra.mxu1 %vm650_vm5, %v626_v36 }
  0xb0   : > { %1237 = vmatmul.msk.f32.gmra.mxu2 %vm650_vm5, %v630_v60  ;;  %1255 = vmatmul.msk.f32.gmra.mxu3 %vm650_vm5, %v629_v56 }
  0xb4   : > { %v557_v62 = vpop.permute.xlu0 %556  ;;  %v448_v38 = vpop.permute.xlu1 %447 }
  0xb5   : > { %v631_v2 = vsel %vm623_vm4, %v610_v61, %v557_v62  ;;  %v611_v3 = vsel %vm602_vm3, %v1533_v49, %v448_v38  ;;  %v452_v49 = vpop.permute.xlu2 %451 }
  0xb6   : > { %v632_v9 = vsel %vm623_vm4, %v611_v3, %v559_v4  ;;  %v613_v16 = vsel %vm602_vm3, %v1553_v63, %v452_v49 }
  0xb7   : > { %1201 = vmatmul.msk.f32.gmra.mxu0 %vm650_vm5, %v630_v60  ;;  %1217 = vmatmul.msk.f32.gmra.mxu1 %vm650_vm5, %v627_v48 }
  0xb8   : > { %1238 = vmatmul.msk.f32.gmra.mxu2 %vm650_vm5, %v631_v2  ;;  %1256 = vmatmul.msk.f32.gmra.mxu3 %vm650_vm5, %v630_v60 }
  0xbc   : > { %v450_v39 = vpop.permute.xlu0 %449  ;;  %v561_v14 = vpop.permute.xlu1 %560 }
  0xbd   : > { %v612_v13 = vsel %vm602_vm3, %v1536_v50, %v450_v39  ;;  %v565_v22 = vpop.permute.xlu2 %564 }
  0xbe   : > { %v633_v15 = vsel %vm623_vm4, %v612_v13, %v561_v14 }
  0xbf   : > { %1202 = vmatmul.msk.f32.gmra.mxu0 %vm650_vm5, %v631_v2  ;;  %1218 = vmatmul.msk.f32.gmra.mxu1 %vm650_vm5, %v628_v42 }
  0xc0   : > { %1239 = vmatmul.msk.f32.gmra.mxu2 %vm650_vm5, %v632_v9  ;;  %1257 = vmatmul.msk.f32.gmra.mxu3 %vm650_vm5, %v631_v2 }
  0xc4   : > { %v563_v17 = vpop.permute.xlu0 %562  ;;  %v454_v50 = vpop.permute.xlu1 %453 }
  0xc5   : > { %v634_v18 = vsel %vm623_vm4, %v613_v16, %v563_v17  ;;  %v614_v21 = vsel %vm602_vm3, %v1560_v5, %v454_v50  ;;  %v458_v5 = vpop.permute.xlu2 %457 }
  0xc6   : > { %v635_v23 = vsel %vm623_vm4, %v614_v21, %v565_v22  ;;  %v616_v27 = vsel %vm602_vm3, %v1576_v20, %v458_v5 }
  0xc7   : > { %1203 = vmatmul.msk.f32.gmra.mxu0 %vm650_vm5, %v632_v9  ;;  %1219 = vmatmul.msk.f32.gmra.mxu1 %vm650_vm5, %v629_v56 }
  0xc8   : > { %1240 = vmatmul.msk.f32.gmra.mxu2 %vm650_vm5, %v633_v15  ;;  %1258 = vmatmul.msk.f32.gmra.mxu3 %vm650_vm5, %v632_v9 }
  0xcc   : > { %v456_v63 = vpop.permute.xlu0 %455  ;;  %v567_v25 = vpop.permute.xlu1 %566 }
  0xcd   : > { %v615_v24 = vsel %vm602_vm3, %v1573_v19, %v456_v63  ;;  %v571_v32 = vpop.permute.xlu2 %570 }
  0xce   : > { %v636_v26 = vsel %vm623_vm4, %v615_v24, %v567_v25 }
  0xcf   : > { %1204 = vmatmul.msk.f32.gmra.mxu0 %vm650_vm5, %v633_v15  ;;  %1220 = vmatmul.msk.f32.gmra.mxu1 %vm650_vm5, %v630_v60 }
  0xd0   : > { %1241 = vmatmul.msk.f32.gmra.mxu2 %vm650_vm5, %v634_v18  ;;  %1259 = vmatmul.msk.f32.gmra.mxu3 %vm650_vm5, %v633_v15 }
  0xd4   : > { %v569_v28 = vpop.permute.xlu0 %568  ;;  %v460_v19 = vpop.permute.xlu1 %459 }
  0xd5   : > { %v637_v31 = vsel %vm623_vm4, %v616_v27, %v569_v28  ;;  %v617_v6 = vsel %vm602_vm3, %v1590_v29, %v460_v19  ;;  %v464_v29 = vpop.permute.xlu2 %463 }
  0xd6   : > { %v638_v33 = vsel %vm623_vm4, %v617_v6, %v571_v32  ;;  %v619_v37 = vsel %vm602_vm3, %v1628_v51, %v464_v29 }
  0xd7   : > { %1205 = vmatmul.msk.f32.gmra.mxu0 %vm650_vm5, %v634_v18  ;;  %1221 = vmatmul.msk.f32.gmra.mxu1 %vm650_vm5, %v631_v2 }
  0xd8   : > { %1242 = vmatmul.msk.f32.gmra.mxu2 %vm650_vm5, %v635_v23  ;;  %1260 = vmatmul.msk.f32.gmra.mxu3 %vm650_vm5, %v634_v18 }
  0xdc   : > { %v462_v20 = vpop.permute.xlu0 %461  ;;  %v573_v35 = vpop.permute.xlu1 %572 }
  0xdd   : > { %v618_v34 = vsel %vm602_vm3, %v1593_v30, %v462_v20  ;;  %v577_v43 = vpop.permute.xlu2 %576 }
  0xde   : > { %v639_v36 = vsel %vm623_vm4, %v618_v34, %v573_v35 }
  0xdf   : > { %1206 = vmatmul.msk.f32.gmra.mxu0 %vm650_vm5, %v635_v23  ;;  %1222 = vmatmul.msk.f32.gmra.mxu1 %vm650_vm5, %v632_v9 }
  0xe0   : > { %1243 = vmatmul.msk.f32.gmra.mxu2 %vm650_vm5, %v636_v26  ;;  %1261 = vmatmul.msk.f32.gmra.mxu3 %vm650_vm5, %v635_v23 }
  0xe4   : > { %v575_v40 = vpop.permute.xlu0 %574  ;;  %v466_v30 = vpop.permute.xlu1 %465 }
  0xe5   : > { %v640_v41 = vsel %vm623_vm4, %v619_v37, %v575_v40  ;;  %v620_v42 = vsel %vm602_vm3, %v1631_v52, %v466_v30  ;;  %v1804_v52 = vld [vmem:[%s1935_s3] ss:$0 sm:$0xff]  ;;  %v470_v53 = vpop.permute.xlu2 %469 }
  0xe6   : > { %v641_v44 = vsel %vm623_vm4, %v620_v42, %v577_v43  ;;  %v622_v54 = vsel %vm602_vm3, %v1666_v12, %v470_v53 }
  0xe7   : > { %1207 = vmatmul.msk.f32.gmra.mxu0 %vm650_vm5, %v636_v26  ;;  %1223 = vmatmul.msk.f32.gmra.mxu1 %vm650_vm5, %v633_v15 }
  0xe8   : > { %1244 = vmatmul.msk.f32.gmra.mxu2 %vm650_vm5, %v637_v31  ;;  %1262 = vmatmul.msk.f32.gmra.mxu3 %vm650_vm5, %v636_v26 }
  0xec   : > { %v468_v51 = vpop.permute.xlu0 %467  ;;  %v579_v46 = vpop.permute.xlu1 %578 }
  0xed   : > { %v621_v45 = vsel %vm602_vm3, %v1663_v10, %v468_v51 }
  0xee   : > { %v642_v7 = vsel %vm623_vm4, %v621_v45, %v579_v46 }
  0xef   : > { %1208 = vmatmul.msk.f32.gmra.mxu0 %vm650_vm5, %v637_v31  ;;  %1224 = vmatmul.msk.f32.gmra.mxu1 %vm650_vm5, %v634_v18 }
  0xf0   : > { %1245 = vmatmul.msk.f32.gmra.mxu2 %vm650_vm5, %v638_v33  ;;  %1263 = vmatmul.msk.f32.gmra.mxu3 %vm650_vm5, %v637_v31 }
  0xf4   : > { %v581_v55 = vpop.permute.xlu0 %580 }
  0xf5   : > { %v643_v56 = vsel %vm623_vm4, %v622_v54, %v581_v55 }
  0xf7   : > { %1209 = vmatmul.msk.f32.gmra.mxu0 %vm650_vm5, %v638_v33  ;;  %1225 = vmatmul.msk.f32.gmra.mxu1 %vm650_vm5, %v635_v23 }
  0xf8   : > { %1246 = vmatmul.msk.f32.gmra.mxu2 %vm650_vm5, %v639_v36  ;;  %1264 = vmatmul.msk.f32.gmra.mxu3 %vm650_vm5, %v638_v33 }
  0xfd   : > { %v794_v0 = vpop.f32.mrf.mxu1 }
  0xff   : > { %1210 = vmatmul.msk.f32.gmra.mxu0 %vm650_vm5, %v639_v36  ;;  %1226 = vmatmul.msk.f32.gmra.mxu1 %vm650_vm5, %v636_v26 }
 0x100   : > { %1247 = vmatmul.msk.f32.gmra.mxu2 %vm650_vm5, %v640_v41  ;;  %1265 = vmatmul.msk.f32.gmra.mxu3 %vm650_vm5, %v639_v36 }
 0x107   : > { %1211 = vmatmul.msk.f32.gmra.mxu0 %vm650_vm5, %v640_v41  ;;  %1227 = vmatmul.msk.f32.gmra.mxu1 %vm650_vm5, %v637_v31 }
 0x108   : > { %1248 = vmatmul.msk.f32.gmra.mxu2 %vm650_vm5, %v641_v44  ;;  %1266 = vmatmul.msk.f32.gmra.mxu3 %vm650_vm5, %v640_v41 }
 0x10c   : > { %v720_v47 = vpop.f32.mrf.mxu0 }
 0x10d   : > { %v795_v48 = vadd.f32 %v794_v0, %v720_v47 }
 0x10f   : > { %v845_v10 = vadd.f32 %v1804_v52, %v795_v48  ;;  %1212 = vmatmul.msk.f32.gmra.mxu0 %vm650_vm5, %v641_v44  ;;  %1228 = vmatmul.msk.f32.gmra.mxu1 %vm650_vm5, %v638_v33 }
 0x110   : > { %1249 = vmatmul.msk.f32.gmra.mxu2 %vm650_vm5, %v642_v7  ;;  %1267 = vmatmul.msk.f32.gmra.mxu3 %vm650_vm5, %v641_v44 }
 0x111   : > { %861 = vst.msk [vmem:[%s1810_s24] sm:$0xff] %vm623_vm4, %v845_v10 }
 0x112   : > { %v977_v57 = vpop.f32.mrf.mxu3 }
 0x117   : > { %1229 = vmatmul.msk.f32.gmra.mxu1 %vm650_vm5, %v639_v36 }
 0x118   : > { %1250 = vmatmul.msk.f32.gmra.mxu2 %vm650_vm5, %v643_v56 }
 0x11a   : > { %v909_v1 = vpop.f32.mrf.mxu2 }
 0x11b   : > { %v978_v58 = vadd.f32 %v977_v57, %v909_v1 }
 0x11c   : > { %v723_v59 = vpop.f32.mrf.mxu0 }
 0x11d   : > { %v1025_v8 = vadd.f32 %v1804_v52, %v978_v58 }
 0x11f   : > { %1268 = vst.msk [vmem:[%s1810_s24 + $0x10] sm:$0xff] %vm623_vm4, %v1025_v8 }
 0x122   : > { %v980_v60 = vpop.f32.mrf.mxu3 }
 0x124   : > { %v726_v12 = vpop.f32.mrf.mxu0  ;;  %v797_v11 = vpop.f32.mrf.mxu1 }
 0x125   : > { %v798_v61 = vadd.f32 %v797_v11, %v723_v59 }
 0x127   : > { %v846_v62 = vadd.f32 %v1804_v52, %v798_v61 }
 0x129   : > { %862 = vst.msk [vmem:[%s1810_s24 + $0x8] sm:$0xff] %vm623_vm4, %v846_v62  ;;  %v912_v2 = vpop.f32.mrf.mxu2 }
 0x12a   : > { %v981_v38 = vadd.f32 %v980_v60, %v912_v2 }
 0x12b   : > { %v983_v3 = vpop.f32.mrf.mxu3 }
 0x12c   : > { %v1026_v4 = vadd.f32 %v1804_v52, %v981_v38  ;;  %v729_v9 = vpop.f32.mrf.mxu0  ;;  %v800_v39 = vpop.f32.mrf.mxu1 }
 0x12d   : > { %v801_v13 = vadd.f32 %v800_v39, %v726_v12 }
 0x12e   : > { %1269 = vst.msk [vmem:[%s1810_s24 + $0x18] sm:$0xff] %vm623_vm4, %v1026_v4 }
 0x12f   : > { %v847_v14 = vadd.f32 %v1804_v52, %v801_v13 }
 0x131   : > { %863 = vst.msk [vmem:[%s1810_s24 + $0x20] sm:$0xff] %vm623_vm4, %v847_v14 }
 0x133   : > { %v915_v15 = vpop.f32.mrf.mxu2  ;;  %v986_v49 = vpop.f32.mrf.mxu3 }
 0x134   : > { %v984_v16 = vadd.f32 %v983_v3, %v915_v15  ;;  %v732_v17 = vpop.f32.mrf.mxu0  ;;  %v803_v18 = vpop.f32.mrf.mxu1 }
 0x135   : > { %v804_v50 = vadd.f32 %v803_v18, %v729_v9 }
 0x136   : > { %v1027_v21 = vadd.f32 %v1804_v52, %v984_v16 }
 0x137   : > { %v848_v22 = vadd.f32 %v1804_v52, %v804_v50 }
 0x138   : > { %1270 = vst.msk [vmem:[%s1810_s24 + $0x30] sm:$0xff] %vm623_vm4, %v1027_v21 }
 0x139   : > { %864 = vst.msk [vmem:[%s1810_s24 + $0x28] sm:$0xff] %vm623_vm4, %v848_v22 }
 0x13b   : > { %v918_v23 = vpop.f32.mrf.mxu2  ;;  %v989_v63 = vpop.f32.mrf.mxu3 }
 0x13c   : > { %v987_v24 = vadd.f32 %v986_v49, %v918_v23  ;;  %v735_v25 = vpop.f32.mrf.mxu0  ;;  %v806_v26 = vpop.f32.mrf.mxu1 }
 0x13d   : > { %v807_v5 = vadd.f32 %v806_v26, %v732_v17 }
 0x13e   : > { %v1028_v27 = vadd.f32 %v1804_v52, %v987_v24 }
 0x13f   : > { %v849_v28 = vadd.f32 %v1804_v52, %v807_v5 }
 0x140   : > { %1271 = vst.msk [vmem:[%s1810_s24 + $0x38] sm:$0xff] %vm623_vm4, %v1028_v27 }
 0x141   : > { %865 = vst.msk [vmem:[%s1810_s24 + $0x40] sm:$0xff] %vm623_vm4, %v849_v28 }
 0x143   : > { %v921_v31 = vpop.f32.mrf.mxu2  ;;  %v992_v19 = vpop.f32.mrf.mxu3 }
 0x144   : > { %v990_v6 = vadd.f32 %v989_v63, %v921_v31  ;;  %v738_v32 = vpop.f32.mrf.mxu0  ;;  %v809_v33 = vpop.f32.mrf.mxu1 }
 0x145   : > { %v810_v20 = vadd.f32 %v809_v33, %v735_v25 }
 0x146   : > { %v1029_v34 = vadd.f32 %v1804_v52, %v990_v6 }
 0x147   : > { %v850_v35 = vadd.f32 %v1804_v52, %v810_v20 }
 0x148   : > { %1272 = vst.msk [vmem:[%s1810_s24 + $0x50] sm:$0xff] %vm623_vm4, %v1029_v34 }
 0x149   : > { %866 = vst.msk [vmem:[%s1810_s24 + $0x48] sm:$0xff] %vm623_vm4, %v850_v35 }
 0x14b   : > { %v924_v36 = vpop.f32.mrf.mxu2  ;;  %v995_v29 = vpop.f32.mrf.mxu3 }
 0x14c   : > { %v993_v37 = vadd.f32 %v992_v19, %v924_v36  ;;  %v741_v40 = vpop.f32.mrf.mxu0  ;;  %v812_v41 = vpop.f32.mrf.mxu1 }
 0x14d   : > { %v813_v30 = vadd.f32 %v812_v41, %v738_v32 }
 0x14e   : > { %v1030_v42 = vadd.f32 %v1804_v52, %v993_v37 }
 0x14f   : > { %v851_v43 = vadd.f32 %v1804_v52, %v813_v30 }
 0x150   : > { %1273 = vst.msk [vmem:[%s1810_s24 + $0x58] sm:$0xff] %vm623_vm4, %v1030_v42 }
 0x151   : > { %867 = vst.msk [vmem:[%s1810_s24 + $0x60] sm:$0xff] %vm623_vm4, %v851_v43 }
 0x153   : > { %v927_v44 = vpop.f32.mrf.mxu2  ;;  %v998_v51 = vpop.f32.mrf.mxu3 }
 0x154   : > { %v996_v45 = vadd.f32 %v995_v29, %v927_v44  ;;  %v744_v0 = vpop.f32.mrf.mxu0  ;;  %v815_v46 = vpop.f32.mrf.mxu1 }
 0x155   : > { %v816_v47 = vadd.f32 %v815_v46, %v741_v40 }
 0x156   : > { %v1031_v48 = vadd.f32 %v1804_v52, %v996_v45 }
 0x157   : > { %v852_v7 = vadd.f32 %v1804_v52, %v816_v47 }
 0x158   : > { %1274 = vst.msk [vmem:[%s1810_s24 + $0x70] sm:$0xff] %vm623_vm4, %v1031_v48 }
 0x159   : > { %868 = vst.msk [vmem:[%s1810_s24 + $0x68] sm:$0xff] %vm623_vm4, %v852_v7 }
 0x15b   : > { %v930_v10 = vpop.f32.mrf.mxu2  ;;  %v1001_v53 = vpop.f32.mrf.mxu3 }
 0x15c   : > { %v999_v54 = vadd.f32 %v998_v51, %v930_v10  ;;  %v747_v55 = vpop.f32.mrf.mxu0  ;;  %v818_v56 = vpop.f32.mrf.mxu1 }
 0x15d   : > { %v819_v57 = vadd.f32 %v818_v56, %v744_v0 }
 0x15e   : > { %v1032_v1 = vadd.f32 %v1804_v52, %v999_v54 }
 0x15f   : > { %v853_v58 = vadd.f32 %v1804_v52, %v819_v57 }
 0x160   : > { %1275 = vst.msk [vmem:[%s1810_s24 + $0x78] sm:$0xff] %vm623_vm4, %v1032_v1 }
 0x161   : > { %869 = vst.msk [vmem:[%s1810_s24 + $0x80] sm:$0xff] %vm623_vm4, %v853_v58 }
 0x163   : > { %v933_v59 = vpop.f32.mrf.mxu2  ;;  %v1004_v8 = vpop.f32.mrf.mxu3 }
 0x164   : > { %v1002_v60 = vadd.f32 %v1001_v53, %v933_v59  ;;  %v750_v12 = vpop.f32.mrf.mxu0  ;;  %v821_v11 = vpop.f32.mrf.mxu1 }
 0x165   : > { %v822_v61 = vadd.f32 %v821_v11, %v747_v55 }
 0x166   : > { %v1033_v62 = vadd.f32 %v1804_v52, %v1002_v60 }
 0x167   : > { %v854_v2 = vadd.f32 %v1804_v52, %v822_v61 }
 0x168   : > { %1276 = vst.msk [vmem:[%s1810_s24 + $0x90] sm:$0xff] %vm623_vm4, %v1033_v62 }
 0x169   : > { %870 = vst.msk [vmem:[%s1810_s24 + $0x88] sm:$0xff] %vm623_vm4, %v854_v2 }
 0x16b   : > { %v936_v38 = vpop.f32.mrf.mxu2  ;;  %v1007_v3 = vpop.f32.mrf.mxu3 }
 0x16c   : > { %v1005_v4 = vadd.f32 %v1004_v8, %v936_v38  ;;  %v753_v9 = vpop.f32.mrf.mxu0  ;;  %v824_v39 = vpop.f32.mrf.mxu1 }
 0x16d   : > { %v825_v13 = vadd.f32 %v824_v39, %v750_v12 }
 0x16e   : > { %v1034_v14 = vadd.f32 %v1804_v52, %v1005_v4 }
 0x16f   : > { %v855_v15 = vadd.f32 %v1804_v52, %v825_v13 }
 0x170   : > { %1277 = vst.msk [vmem:[%s1810_s24 + $0x98] sm:$0xff] %vm623_vm4, %v1034_v14 }
 0x171   : > { %871 = vst.msk [vmem:[%s1810_s24 + $0xa0] sm:$0xff] %vm623_vm4, %v855_v15 }
 0x173   : > { %v939_v49 = vpop.f32.mrf.mxu2  ;;  %v1010_v16 = vpop.f32.mrf.mxu3 }
 0x174   : > { %v1008_v17 = vadd.f32 %v1007_v3, %v939_v49  ;;  %v827_v18 = vpop.f32.mrf.mxu1  ;;  %v756_v22 = vpop.f32.mrf.mxu0 }
 0x175   : > { %v828_v50 = vadd.f32 %v827_v18, %v753_v9 }
 0x176   : > { %v1035_v21 = vadd.f32 %v1804_v52, %v1008_v17 }
 0x177   : > { %v856_v23 = vadd.f32 %v1804_v52, %v828_v50 }
 0x178   : > { %1278 = vst.msk [vmem:[%s1810_s24 + $0xb0] sm:$0xff] %vm623_vm4, %v1035_v21 }
 0x179   : > { %872 = vst.msk [vmem:[%s1810_s24 + $0xa8] sm:$0xff] %vm623_vm4, %v856_v23 }
 0x17b   : > { %v942_v63 = vpop.f32.mrf.mxu2  ;;  %v1013_v26 = vpop.f32.mrf.mxu3 }
 0x17c   : > { %v1011_v24 = vadd.f32 %v1010_v16, %v942_v63  ;;  %v830_v25 = vpop.f32.mrf.mxu1  ;;  %v759_v31 = vpop.f32.mrf.mxu0 }
 0x17d   : > { %v831_v5 = vadd.f32 %v830_v25, %v756_v22 }
 0x17e   : > { %v1036_v27 = vadd.f32 %v1804_v52, %v1011_v24 }
 0x17f   : > { %v857_v28 = vadd.f32 %v1804_v52, %v831_v5 }
 0x180   : > { %1279 = vst.msk [vmem:[%s1810_s24 + $0xb8] sm:$0xff] %vm623_vm4, %v1036_v27 }
 0x181   : > { %873 = vst.msk [vmem:[%s1810_s24 + $0xc0] sm:$0xff] %vm623_vm4, %v857_v28 }
 0x183   : > { %v945_v19 = vpop.f32.mrf.mxu2  ;;  %v1016_v34 = vpop.f32.mrf.mxu3 }
 0x184   : > { %v1014_v6 = vadd.f32 %v1013_v26, %v945_v19  ;;  %v833_v32 = vpop.f32.mrf.mxu1  ;;  %v762_v36 = vpop.f32.mrf.mxu0 }
 0x185   : > { %v834_v33 = vadd.f32 %v833_v32, %v759_v31 }
 0x186   : > { %v1037_v20 = vadd.f32 %v1804_v52, %v1014_v6 }
 0x187   : > { %v858_v35 = vadd.f32 %v1804_v52, %v834_v33 }
 0x188   : > { %1280 = vst.msk [vmem:[%s1810_s24 + $0xd0] sm:$0xff] %vm623_vm4, %v1037_v20 }
 0x189   : > { %874 = vst.msk [vmem:[%s1810_s24 + $0xc8] sm:$0xff] %vm623_vm4, %v858_v35 }
 0x18b   : > { %v948_v29 = vpop.f32.mrf.mxu2  ;;  %v1019_v43 = vpop.f32.mrf.mxu3 }
 0x18c   : > { %v1017_v37 = vadd.f32 %v1016_v34, %v948_v29  ;;  %v836_v40 = vpop.f32.mrf.mxu1  ;;  %v765_v51 = vpop.f32.mrf.mxu0 }
 0x18d   : > { %v837_v41 = vadd.f32 %v836_v40, %v762_v36 }
 0x18e   : > { %v1038_v30 = vadd.f32 %v1804_v52, %v1017_v37 }
 0x18f   : > { %v859_v42 = vadd.f32 %v1804_v52, %v837_v41 }
 0x190   : > { %1281 = vst.msk [vmem:[%s1810_s24 + $0xd8] sm:$0xff] %vm623_vm4, %v1038_v30 }
 0x191   : > { %875 = vst.msk [vmem:[%s1810_s24 + $0xe0] sm:$0xff] %vm623_vm4, %v859_v42 }
 0x193   : > { %v951_v44 = vpop.f32.mrf.mxu2  ;;  %v1022_v7 = vpop.f32.mrf.mxu3 }
 0x194   : > { %v1020_v45 = vadd.f32 %v1019_v43, %v951_v44  ;;  %v839_v0 = vpop.f32.mrf.mxu1 }
 0x195   : > { %v840_v46 = vadd.f32 %v839_v0, %v765_v51 }
 0x196   : > { %v1039_v47 = vadd.f32 %v1804_v52, %v1020_v45 }
 0x197   : > { %v860_v48 = vadd.f32 %v1804_v52, %v840_v46 }
 0x198   : > { %1282 = vst.msk [vmem:[%s1810_s24 + $0xf0] sm:$0xff] %vm623_vm4, %v1039_v47 }
 0x199   : > { %876 = vst.msk [vmem:[%s1810_s24 + $0xe8] sm:$0xff] %vm623_vm4, %v860_v48 }
 0x19b   : > { %v954_v10 = vpop.f32.mrf.mxu2 }
 0x19c   : > { %v1023_v53 = vadd.f32 %v1022_v7, %v954_v10 }
 0x19e   : > { %v1040_v54 = vadd.f32 %v1804_v52, %v1023_v53 }
 0x1a0   : > { %1283 = vst.msk [vmem:[%s1810_s24 + $0xf8] sm:$0xff] %vm623_vm4, %v1040_v54 }
 0x1a1 PF: > { %s14_s19 = sadd.s32 1, %s1379_s19   ;;  %s1937_s15 = smov %s1371_s17 }
 0x1a2   : > { %p11_p9 = scmp.ge.s32.totalorder %s14_s19, 6   ;;  %s1938_s16 = smov %s1375_s18 }
 0x1a3   : > { %s1939_s17 = smov %s1942_s20  ;;  %s1940_s18 = smov %s1946_s21 }
 0x1a4   :  { %13 = sbr.rel (!%p11_p9) target bundleno = 3 (0x3), region = 73 }

</bundles_post_ra>
